<compile_context>
chip_gen: v5e
topology: v5e:2x2
jax: 0.10.0
libtpu: 0.0.40
codegen_flags: <defaults>
</compile_context>

<pallas_src>
import jax
import jax.numpy as jnp
from jax.experimental import pallas as pl
from jax.experimental.pallas import tpu as pltpu

LANES = 128


def _cdiv(a, b):
    return (a + b - 1) // b


def _round_up(v, m):
    return _cdiv(v, m) * m


def mininet_kernel(x_ref, w_ref, b_ref, o_ref):
    """x: [tb_rows, 128] VMEM;  w, b: [n] SMEM scalars;  o: [n, tb_rows, 128] VMEM."""
    x = x_ref[...]                                # lane-dense f32 tile
    n = o_ref.shape[0]
    for j in range(n):                            # n is tiny & static -> unrolled at trace time
        h = x * w_ref[j] + b_ref[j]               # scalar broadcast from SMEM, pure VPU
        # sigmoid(h) == 0.5*(tanh(h/2)+1): single EUP transcendental (vs exp + divide).
        o_ref[j] = (0.5 * jnp.tanh(0.5 * h) + 0.5).astype(o_ref.dtype)


def mininet_multi_forward(
    x,
    params,
    *,
    target_rows=2048,          # rows of the [., 128] view per grid step (~1 MiB in / 4 MiB out)
    out_dtype=jnp.float32,     # pass jnp.bfloat16 to halve writeback traffic (sigmoid in (0,1))
    force_kernel=False,
    min_kernel_batch=4096,
):
    """Forward pass of MiniNet_multi for x of shape [B, 1]. Returns [B, n]."""
    w1, b1, w2, b2, w3, b3 = params
    B = x.shape[0]
    n_out = w3.shape[1]

    # Fold the affine chain once (outside the kernel, negligible cost, exact up to reassoc).
    w_eff = ((w1 @ w2) @ w3).reshape(n_out)                       # [n]
    b_eff = ((b1 @ w2) @ w3 + b2 @ w3 + b3).reshape(n_out)        # [n]

    if B < min_kernel_batch and not force_kernel:
        # Tiny batches: pallas_call launch + DMA setup exceeds the useful work.
        h = x.reshape(B, 1) * w_eff[None, :] + b_eff[None, :]
        return jax.nn.sigmoid(h).astype(out_dtype)

    # ---- lane-dense tiling of the batch -------------------------------------------------
    xf = x.reshape(B)                              # [B,1] -> flat, contiguous, free reshape
    r_min = _cdiv(B, LANES)                        # rows of the [., 128] view
    if r_min <= 8:
        # Single full-extent block (block dim == array dim satisfies the (8,128) rule).
        tb_rows = r_min
        rows = r_min
    else:
        # >=2 tiles so v7x can shard across both TensorCores; each tile <= target_rows.
        tb_rows = min(target_rows, _round_up(_cdiv(r_min, 2), 8))
        rows = _round_up(r_min, tb_rows)
    bp = rows * LANES
    if bp != B:
        xf = jnp.pad(xf, (0, bp - B))              # only up to the block/lane boundary
    x2d = xf.reshape(rows, LANES)                  # lane-dense [R, 128] view
    grid = (rows // tb_rows,)

    out_cm = pl.pallas_call(
        mininet_kernel,
        out_shape=jax.ShapeDtypeStruct((n_out, rows, LANES), out_dtype),
        grid=grid,
        in_specs=[
            # x: lane-dense batch tile, double-buffered by the BlockSpec pipeline.
            pl.BlockSpec((tb_rows, LANES), lambda i: (i, 0)),
            # Folded weight / bias: n scalars each, resident in SMEM.
            pl.BlockSpec(memory_space=pltpu.MemorySpace.SMEM),
            pl.BlockSpec(memory_space=pltpu.MemorySpace.SMEM),
        ],
        # Channel-major, lane-dense output -> unmasked full-width stores / dense writeback.
        out_specs=pl.BlockSpec((n_out, tb_rows, LANES), lambda i: (0, i, 0)),
        compiler_params=pltpu.CompilerParams(
            dimension_semantics=("parallel",),     # shard batch tiles over TCs (v7x megacore)
            vmem_limit_bytes=32 * 1024 * 1024,     # explicit (v5e scoped default is 16 MiB)
        ),
    )(x2d, w_eff, b_eff)

    # [n, R, 128] -> [n, Bp] -> [B, n]; layout fix-up only at the wrapper boundary.
    out = out_cm.reshape(n_out, bp)[:, :B].T
    return out


def init_params(key, n=4):
    """Deterministic synthetic init matching nn.Linear shapes.

    PyTorch stores Linear weight as [out, in]; we store the transpose [in, out] so the
    math is x @ W directly.  Biases kept 2-D ([1, out]) for broadcasting.
    """
    k1, k2, k3, k4, k5, k6 = jax.random.split(key, 6)
    w1 = jax.random.normal(k1, (1, 128), jnp.float32) * 0.1     # dense:  1 -> 128
    b1 = jax.random.normal(k2, (1, 128), jnp.float32) * 0.01
    w2 = jax.random.normal(k3, (128, 64), jnp.float32) * 0.1    # dense2: 128 -> 64
    b2 = jax.random.normal(k4, (1, 64), jnp.float32) * 0.01
    w3 = jax.random.normal(k5, (64, n), jnp.float32) * 0.1      # dense3: 64 -> n
    b3 = jax.random.normal(k6, (1, n), jnp.float32) * 0.01
    return (w1, b1, w2, b2, w3, b3)


def reference_forward(x, params):
    """Layer-by-layer pure-JAX reference of the PyTorch forward."""
    w1, b1, w2, b2, w3, b3 = params
    h = x @ w1 + b1
    h = h @ w2 + b2
    h = h @ w3 + b3
    return jax.nn.sigmoid(h)


if __name__ == "__main__":
    key = jax.random.PRNGKey(0)
    k_x, k_p = jax.random.split(key)

    n = 4
    batch = 256
    # Module input is [..., 1] (Linear with in_features=1).
    x = jax.random.normal(k_x, (batch, 1), jnp.float32)
    params = init_params(k_p, n=n)

    out = mininet_multi_forward(x, params, force_kernel=True)
    out = jax.block_until_ready(out)

    ref = reference_forward(x, params)
    assert out.shape == (batch, n)
    # Folding reassociates f32 products and sigmoid uses the exact tanh identity;
    # expect ~1e-6 level differences, allow 1e-4 headroom.
    assert jnp.allclose(out, ref, atol=1e-4, rtol=1e-4), "mismatch vs reference"

    print("KERNEL_OK")
</pallas_src>

<mosaic_0001>
module attributes {stable_mosaic.version = 11 : i64} {
  func.func @mininet_kernel(%arg0: i32, %arg1: memref<2x128xf32, #tpu.memory_space<vmem>>, %arg2: memref<4xf32, #tpu.memory_space<smem>>, %arg3: memref<4xf32, #tpu.memory_space<smem>>, %arg4: memref<4x2x128xf32, #tpu.memory_space<vmem>>) attributes {dimension_semantics = [#tpu.dimension_semantics<parallel>], iteration_bounds = array<i64: 1>, scalar_prefetch = 0 : i64, scratch_operands = 0 : i64, tpu.core_type = #tpu.core_type<tc>, window_params = [{transform_indices = @transform_0, window_bounds = array<i64: 2, 128>}, {transform_indices = @transform_1, window_bounds = array<i64: 4>}, {transform_indices = @transform_2, window_bounds = array<i64: 4>}, {transform_indices = @transform_3, window_bounds = array<i64: 4, 2, 128>}]} {
    %c0 = arith.constant 0 : index
    %c0_0 = arith.constant 0 : index
    %0 = vector.load %arg1[%c0, %c0_0] : memref<2x128xf32, #tpu.memory_space<vmem>>, vector<2x128xf32>
    %c0_1 = arith.constant 0 : index
    %1 = memref.load %arg2[%c0_1] : memref<4xf32, #tpu.memory_space<smem>>
    %2 = vector.broadcast %1 : f32 to vector<2x128xf32>
    %3 = arith.mulf %0, %2 : vector<2x128xf32>
    %c0_2 = arith.constant 0 : index
    %4 = memref.load %arg3[%c0_2] : memref<4xf32, #tpu.memory_space<smem>>
    %5 = vector.broadcast %4 : f32 to vector<2x128xf32>
    %6 = arith.addf %3, %5 : vector<2x128xf32>
    %cst = arith.constant 5.000000e-01 : f32
    %7 = vector.broadcast %cst : f32 to vector<2x128xf32>
    %8 = arith.mulf %7, %6 : vector<2x128xf32>
    %9 = math.tanh %8 : vector<2x128xf32>
    %cst_3 = arith.constant 5.000000e-01 : f32
    %10 = vector.broadcast %cst_3 : f32 to vector<2x128xf32>
    %11 = arith.mulf %10, %9 : vector<2x128xf32>
    %cst_4 = arith.constant 5.000000e-01 : f32
    %12 = vector.broadcast %cst_4 : f32 to vector<2x128xf32>
    %13 = arith.addf %11, %12 : vector<2x128xf32>
    %c0_5 = arith.constant 0 : index
    %c0_6 = arith.constant 0 : index
    %c0_7 = arith.constant 0 : index
    %14 = vector.load %arg4[%c0_5, %c0_6, %c0_7] : memref<4x2x128xf32, #tpu.memory_space<vmem>>, vector<1x2x128xf32>
    %15 = vector.shape_cast %14 : vector<1x2x128xf32> to vector<2x128xf32>
    %16 = vector.shape_cast %13 : vector<2x128xf32> to vector<1x2x128xf32>
    tpu.vector_store %arg4[%c0_5, %c0_6, %c0_7], %16 {strides = array<i32>} : memref<4x2x128xf32, #tpu.memory_space<vmem>>, vector<1x2x128xf32>,
    %c1 = arith.constant 1 : index
    %17 = memref.load %arg2[%c1] : memref<4xf32, #tpu.memory_space<smem>>
    %18 = vector.broadcast %17 : f32 to vector<2x128xf32>
    %19 = arith.mulf %0, %18 : vector<2x128xf32>
    %c1_8 = arith.constant 1 : index
    %20 = memref.load %arg3[%c1_8] : memref<4xf32, #tpu.memory_space<smem>>
    %21 = vector.broadcast %20 : f32 to vector<2x128xf32>
    %22 = arith.addf %19, %21 : vector<2x128xf32>
    %cst_9 = arith.constant 5.000000e-01 : f32
    %23 = vector.broadcast %cst_9 : f32 to vector<2x128xf32>
    %24 = arith.mulf %23, %22 : vector<2x128xf32>
    %25 = math.tanh %24 : vector<2x128xf32>
    %cst_10 = arith.constant 5.000000e-01 : f32
    %26 = vector.broadcast %cst_10 : f32 to vector<2x128xf32>
    %27 = arith.mulf %26, %25 : vector<2x128xf32>
    %cst_11 = arith.constant 5.000000e-01 : f32
    %28 = vector.broadcast %cst_11 : f32 to vector<2x128xf32>
    %29 = arith.addf %27, %28 : vector<2x128xf32>
    %c1_12 = arith.constant 1 : index
    %c0_13 = arith.constant 0 : index
    %c0_14 = arith.constant 0 : index
    %30 = vector.load %arg4[%c1_12, %c0_13, %c0_14] : memref<4x2x128xf32, #tpu.memory_space<vmem>>, vector<1x2x128xf32>
    %31 = vector.shape_cast %30 : vector<1x2x128xf32> to vector<2x128xf32>
    %32 = vector.shape_cast %29 : vector<2x128xf32> to vector<1x2x128xf32>
    tpu.vector_store %arg4[%c1_12, %c0_13, %c0_14], %32 {strides = array<i32>} : memref<4x2x128xf32, #tpu.memory_space<vmem>>, vector<1x2x128xf32>,
    %c2 = arith.constant 2 : index
    %33 = memref.load %arg2[%c2] : memref<4xf32, #tpu.memory_space<smem>>
    %34 = vector.broadcast %33 : f32 to vector<2x128xf32>
    %35 = arith.mulf %0, %34 : vector<2x128xf32>
    %c2_15 = arith.constant 2 : index
    %36 = memref.load %arg3[%c2_15] : memref<4xf32, #tpu.memory_space<smem>>
    %37 = vector.broadcast %36 : f32 to vector<2x128xf32>
    %38 = arith.addf %35, %37 : vector<2x128xf32>
    %cst_16 = arith.constant 5.000000e-01 : f32
    %39 = vector.broadcast %cst_16 : f32 to vector<2x128xf32>
    %40 = arith.mulf %39, %38 : vector<2x128xf32>
    %41 = math.tanh %40 : vector<2x128xf32>
    %cst_17 = arith.constant 5.000000e-01 : f32
    %42 = vector.broadcast %cst_17 : f32 to vector<2x128xf32>
    %43 = arith.mulf %42, %41 : vector<2x128xf32>
    %cst_18 = arith.constant 5.000000e-01 : f32
    %44 = vector.broadcast %cst_18 : f32 to vector<2x128xf32>
    %45 = arith.addf %43, %44 : vector<2x128xf32>
    %c2_19 = arith.constant 2 : index
    %c0_20 = arith.constant 0 : index
    %c0_21 = arith.constant 0 : index
    %46 = vector.load %arg4[%c2_19, %c0_20, %c0_21] : memref<4x2x128xf32, #tpu.memory_space<vmem>>, vector<1x2x128xf32>
    %47 = vector.shape_cast %46 : vector<1x2x128xf32> to vector<2x128xf32>
    %48 = vector.shape_cast %45 : vector<2x128xf32> to vector<1x2x128xf32>
    tpu.vector_store %arg4[%c2_19, %c0_20, %c0_21], %48 {strides = array<i32>} : memref<4x2x128xf32, #tpu.memory_space<vmem>>, vector<1x2x128xf32>,
    %c3 = arith.constant 3 : index
    %49 = memref.load %arg2[%c3] : memref<4xf32, #tpu.memory_space<smem>>
    %50 = vector.broadcast %49 : f32 to vector<2x128xf32>
    %51 = arith.mulf %0, %50 : vector<2x128xf32>
    %c3_22 = arith.constant 3 : index
    %52 = memref.load %arg3[%c3_22] : memref<4xf32, #tpu.memory_space<smem>>
    %53 = vector.broadcast %52 : f32 to vector<2x128xf32>
    %54 = arith.addf %51, %53 : vector<2x128xf32>
    %cst_23 = arith.constant 5.000000e-01 : f32
    %55 = vector.broadcast %cst_23 : f32 to vector<2x128xf32>
    %56 = arith.mulf %55, %54 : vector<2x128xf32>
    %57 = math.tanh %56 : vector<2x128xf32>
    %cst_24 = arith.constant 5.000000e-01 : f32
    %58 = vector.broadcast %cst_24 : f32 to vector<2x128xf32>
    %59 = arith.mulf %58, %57 : vector<2x128xf32>
    %cst_25 = arith.constant 5.000000e-01 : f32
    %60 = vector.broadcast %cst_25 : f32 to vector<2x128xf32>
    %61 = arith.addf %59, %60 : vector<2x128xf32>
    %c3_26 = arith.constant 3 : index
    %c0_27 = arith.constant 0 : index
    %c0_28 = arith.constant 0 : index
    %62 = vector.load %arg4[%c3_26, %c0_27, %c0_28] : memref<4x2x128xf32, #tpu.memory_space<vmem>>, vector<1x2x128xf32>
    %63 = vector.shape_cast %62 : vector<1x2x128xf32> to vector<2x128xf32>
    %64 = vector.shape_cast %61 : vector<2x128xf32> to vector<1x2x128xf32>
    tpu.vector_store %arg4[%c3_26, %c0_27, %c0_28], %64 {strides = array<i32>} : memref<4x2x128xf32, #tpu.memory_space<vmem>>, vector<1x2x128xf32>,
    return
  }
  func.func @transform_0(%arg0: i32) -> (i32, i32) {
    %c0_i32 = arith.constant 0 : i32
    %c0_i32_0 = arith.constant 0 : i32
    return %arg0, %c0_i32 : i32, i32
  }
  func.func @transform_1(%arg0: i32) -> i32 {
    %c0_i32 = arith.constant 0 : i32
    %c0_i32_0 = arith.constant 0 : i32
    return %c0_i32 : i32
  }
  func.func @transform_2(%arg0: i32) -> i32 {
    %c0_i32 = arith.constant 0 : i32
    %c0_i32_0 = arith.constant 0 : i32
    return %c0_i32 : i32
  }
  func.func @transform_3(%arg0: i32) -> (i32, i32, i32) {
    %c0_i32 = arith.constant 0 : i32
    %c0_i32_0 = arith.constant 0 : i32
    %c0_i32_1 = arith.constant 0 : i32
    return %c0_i32, %arg0, %c0_i32_0 : i32, i32, i32
  }
}

</mosaic_0001>

<bundles_post_ra>
// kernel: tpu_custom_call.1
= control target key start
LH: loop header
LB: loop body
LE: loop exit
PB: predicated region body
PF: predicated region fallthrough
CT: control target
= control target key end

     0   :  { %8 = vsyncpa [#allocation3], 0  ;;  %s261_s0 = inlined_call_operand.hbm [shape: f32[2,128], index: 0, kind: input, shape index: {}]   ;;  %s262_s1 = inlined_call_operand.hbm [shape: f32[4], index: 1, kind: input, shape index: {}]   ;;  %s263_s2 = inlined_call_operand.vmem [shape: f32[4], index: 2, kind: input, shape index: {}]   ;;  %s264_s3 = inlined_call_operand.hbm [shape: f32[4,2,128], index: 3, kind: output, shape index: {}]  }
   0x1   :  { %9 = vsyncpa [#allocation5], 0 }
   0x2   :  { %10 = vsyncpa [#allocation6], 0 }
   0x3   :  { %11 = vsyncpa [#allocation4], 0  ;;  %s17_s14 = sshll.u32 %s261_s0, 4  ;;  %s223_s15 = smov [#allocation2]   ;;  %s18_s14 = int_to_ptr.hbm [resolvable:$true] %s17_s14 }
   0x4   :  { %s19_s16 = sshll.u32 %s223_s15, 4  ;;  %s28_s19 = sshll.u32 %s262_s1, 4  ;;  %s20_s16 = int_to_ptr.vmem [resolvable:$true] %s19_s16  ;;  %s29_s19 = int_to_ptr.hbm [resolvable:$true] %s28_s19 }
   0x5   :  { %22 = dma.hbm_to_vmem [thread:$0]  %s18_s14, 32, %s20_s16, [#allocation3]  }
   0x6   :  { %s224_s20 = smov [#allocation7]   ;;  %s37_s23 = sshll.u32 %s263_s2, 4  ;;  %s38_s23 = int_to_ptr.vmem [resolvable:$true] %s37_s23 }
   0x7   :  { %31 = dma.hbm_to_smem %s29_s19, 16, %s224_s20, [#allocation5]  }
   0x8   :  { %s225_s24 = smov [#allocation8]  }
   0x9   :  { %40 = dma.vmem_to_smem %s38_s23, 16, %s225_s24, [#allocation6]  }
   0xa   :  { %215 = dma.done.wait [#allocation3], 32  }
   0xb   :  { %216 = vsyncadd [#allocation3], 4294967264 }
   0xc   :  { %217 = dma.done.wait [#allocation5], 16  }
   0xd   :  { %218 = vsyncadd [#allocation5], 4294967280 }
   0xe   :  { %219 = dma.done.wait [#allocation6], 16  }
   0xf   :  { %220 = vsyncadd [#allocation6], 4294967280 }
  0x10   :  { %53 = sfence }
  0x11   :  { %s55_s0 = sld [smem:[#allocation7]]  ;;  %v54_v0 = vld [vmem:[#allocation2] sm:$0x3]  ;;  %s226_s30 = smov [#allocation9]  }
  0x12   :  { %s58_s1 = sld [smem:[#allocation8]]  ;;  %s106_s4 = sshll.u32 %s226_s30, 4  ;;  %s107_s4 = int_to_ptr.vmem [resolvable:$true] %s106_s4 }
  0x13   :  { %s123_s25 = sld [smem:[#allocation7 + $0x1]]  ;;  %s108_s7 = sshll.u32 %s264_s3, 4  ;;  %s109_s7 = int_to_ptr.hbm [resolvable:$true] %s108_s7 }
  0x14   :  { %s124_s26 = sld [smem:[#allocation8 + $0x1]]  ;;  %s227_s8 = smov 32  }
  0x15   :  { %s125_s27 = sld [smem:[#allocation7 + $0x2]]  ;;  %s228_s9 = smov 2  }
  0x16   :  { %s126_s28 = sld [smem:[#allocation8 + $0x2]] }
  0x17   :  { %v56_v1 = vstv %s55_s0  ;;  %s127_s29 = sld [smem:[#allocation7 + $0x3]] }
  0x18   :  { %v57_v2 = vmul.f32 %v56_v1, %v54_v0  ;;  %v59_v3 = vstv %s58_s1  ;;  %s128_s2 = sld [smem:[#allocation8 + $0x3]] }
  0x19   :  { %v67_v4 = vstv %s123_s25 }
  0x1a   :  { %v60_v5 = vadd.f32 %v59_v3, %v57_v2  ;;  %v68_v6 = vmul.f32 %v67_v4, %v54_v0  ;;  %v70_v7 = vstv %s124_s26 }
  0x1b   :  { %v79_v8 = vstv %s125_s27 }
  0x1c   :  { %v61_v9 = vmul.f32 0.5, %v60_v5  ;;  %v71_v10 = vadd.f32 %v70_v7, %v68_v6  ;;  %v80_v11 = vmul.f32 %v79_v8, %v54_v0  ;;  %v82_v12 = vstv %s126_s28 }
  0x1d   :  { %v91_v13 = vstv %s127_s29 }
  0x1e   :  { %135 = vtanh.f32 %v61_v9  ;;  %v72_v14 = vmul.f32 0.5, %v71_v10  ;;  %v83_v15 = vadd.f32 %v82_v12, %v80_v11  ;;  %v92_v16 = vmul.f32 %v91_v13, %v54_v0 }
  0x1f   :  { %v94_v17 = vstv %s128_s2 }
  0x20   :  { %137 = vtanh.f32 %v72_v14  ;;  %v84_v18 = vmul.f32 0.5, %v83_v15  ;;  %v95_v19 = vadd.f32 %v94_v17, %v92_v16 }
  0x22   :  { %139 = vtanh.f32 %v84_v18  ;;  %v96_v20 = vmul.f32 0.5, %v95_v19 }
  0x24   :  { %v136_v21 = vpop.eup %135  ;;  %141 = vtanh.f32 %v96_v20 }
  0x25   :  { %v63_v22 = vmul.f32 0.5, %v136_v21 }
  0x26   :  { %v138_v23 = vpop.eup %137 }
  0x27   :  { %v64_v24 = vadd.f32 0.5, %v63_v22  ;;  %v74_v25 = vmul.f32 0.5, %v138_v23 }
  0x28   :  { %v140_v26 = vpop.eup %139 }
  0x29   :  { %65 = vst [vmem:[#allocation9] sm:$0x3] %v64_v24  ;;  %v75_v27 = vadd.f32 0.5, %v74_v25  ;;  %v86_v28 = vmul.f32 0.5, %v140_v26 }
  0x2a   :  { %v142_v29 = vpop.eup %141 }
  0x2b   :  { %77 = vst [vmem:[#allocation9 + $0x2] sm:$0x3] %v75_v27  ;;  %v87_v30 = vadd.f32 0.5, %v86_v28  ;;  %v98_v31 = vmul.f32 0.5, %v142_v29 }
  0x2d   :  { %89 = vst [vmem:[#allocation9 + $0x4] sm:$0x3] %v87_v30  ;;  %v99_v32 = vadd.f32 0.5, %v98_v31 }
  0x2f   :  { %101 = vst [vmem:[#allocation9 + $0x6] sm:$0x3] %v99_v32 }
  0x30   :  { %114 = dma.vmem_to_hbm [thread:$0]  %s107_s4, 128, %s109_s7, [#allocation4], %s227_s8, %s227_s8, %s228_s9  }
  0x31   :  { %221 = dma.done.wait [#allocation4], 128  }
  0x32   :  { %222 = vsyncadd [#allocation4], 4294967168 }
  0x33   :  { %119 = vsyncpa [#allocation3], 1 }
  0x34   :  { %120 = vsyncpa [#allocation4], 1 }
  0x35   :  { %121 = vsyncpa [#allocation5], 1 }
  0x36   :  { %122 = vsyncpa [#allocation6], 1 }

</bundles_post_ra>
